<compile_context>
chip_gen: v6e
topology: v6e:2x2x1
jax: 0.10.0
libtpu: 0.0.40
codegen_flags: <defaults>
</compile_context>

<pallas_src>
import functools

import jax
import jax.numpy as jnp
from jax import lax
from jax.experimental import pallas as pl
from jax.experimental.pallas import tpu as pltpu


# Row-tile granularity.  32 keeps native sublane tiling for f32, bf16 and
# 8-bit inputs alike.
_ROW_ROUND = 32


def _chip_config():
    """Returns (num_core_splits, working_set_budget_bytes, vmem_limit_bytes)."""
    vmem_cap = None
    try:
        vmem_cap = int(pltpu.get_tpu_info().vmem_capacity_bytes)
    except Exception:  # query unavailable -> fall through to conservative path
        vmem_cap = None
    if vmem_cap is not None and vmem_cap > 64 * 1024 * 1024:
        # v5e / v6e: 128 MiB VMEM, single TensorCore per chip.  No core split
        # (it would only add padding / an extra mostly-masked sweep), large
        # resident tiles, raised scoped-VMEM limit.
        return 1, 80 * 1024 * 1024, 96 * 1024 * 1024
    # v7x-like (64 MiB VMEM per TC, 2 TensorCores) -- also the conservative
    # default when the hardware query fails.  The leading "parallel" grid
    # axis shards rows across both cores; on a 1-TC chip it simply runs
    # sequentially (still correct).
    return 2, 40 * 1024 * 1024, 48 * 1024 * 1024


def _pick_tile_n(n_rows, n_classes, itemsize, num_splits, ws_budget):
    # Resident VMEM per tile row:
    #   x tile, double-buffered:                      2 * C * itemsize
    #   f32 in-kernel temporaries (z, exp_z, and the
    #   two masked selects), allowance:               4 * C * 4
    #   (tile_n, 1) int32 target block, double-
    #   buffered, lane dim padded to 128:             2 * 512
    #   two (tile_n, 1) f32 accumulators (scratch,
    #   single-buffered), lane dim padded to 128:     2 * 512
    per_row = 2 * n_classes * itemsize + 4 * n_classes * 4 + 2 * 512 + 2 * 512
    max_rows = max(_ROW_ROUND, (ws_budget // per_row) // _ROW_ROUND * _ROW_ROUND)
    # No point tiling wider than this core-split's share of the rows.
    rows_per_split = -(-n_rows // num_splits)
    rows_per_split = -(-rows_per_split // _ROW_ROUND) * _ROW_ROUND
    return max(_ROW_ROUND, min(max_rows, rows_per_split))


def _focal_loss_kernel(x_ref, tgt_ref, w_ref, num_ref, den_ref,
                       num_acc, den_acc, *, gamma, n_valid, tile_n):
    c = pl.program_id(0)          # core-split ("parallel") axis
    j = pl.program_id(1)          # row-tile   ("arbitrary") axis
    nj = pl.num_programs(1)

    # Zero the per-core vector accumulators at the start of each row sweep.
    @pl.when(j == 0)
    def _():
        num_acc[...] = jnp.zeros_like(num_acc)
        den_acc[...] = jnp.zeros_like(den_acc)

    x = x_ref[...].astype(jnp.float32)                        # (TN, C)

    # Numerically stable log-softmax pieces over the class (lane) axis.
    m = jnp.max(x, axis=1, keepdims=True)                     # (TN, 1)
    z = x - m
    exp_z = jnp.exp(z)                                        # O(N*C) EUP work
    lse = jnp.log(jnp.sum(exp_z, axis=1, keepdims=True))      # (TN, 1)
    # (If XLU-bound on v7x: replace the sum above with exp_z @ ones((C,1)).)

    # Gather the target-class entries with a single shared one-hot mask and
    # two jnp.where selects (no bool->f32 convert, no full-tile multiplies).
    tgt = tgt_ref[...]                                        # (TN, 1) int32
    cls = lax.broadcasted_iota(jnp.int32, x.shape, dimension=1)
    hit = cls == tgt                                          # (TN, C) bool

    sel_z = jnp.sum(jnp.where(hit, z, 0.0), axis=1, keepdims=True)
    sel_logpt = sel_z - lse                                   # logpt[i, y_i]
    w = w_ref[...].astype(jnp.float32)                        # (1, C)
    sel_w = jnp.sum(jnp.where(hit, w, 0.0), axis=1, keepdims=True)  # w[y_i]

    # Mask padded rows (global row >= n_valid contributes nothing).
    tile_idx = c * nj + j
    row = tile_idx * tile_n + lax.broadcasted_iota(jnp.int32, sel_w.shape, 0)
    sel_w = sel_w * (row < n_valid).astype(jnp.float32)

    # Focal term on the selected (TN, 1) entries only -> O(N) transcendentals
    # for this part.
    pt_sel = jnp.exp(sel_logpt)
    base = 1.0 - pt_sel
    if float(gamma) == int(gamma):
        focal_sel = lax.integer_pow(base, int(gamma)) * sel_logpt
    else:
        # Intentional difference vs. PyTorch: clamp a marginally negative
        # base instead of producing NaN for fractional gamma.
        focal_sel = (jnp.maximum(base, 0.0) ** float(gamma)) * sel_logpt

    # Elementwise (TN, 1) accumulation; no per-step scalar reduce / store.
    num_acc[...] += -sel_w * focal_sel
    den_acc[...] += sel_w

    # Single reduce + lane-dense (8, 128) store per core sweep.  The output
    # block index is constant over j, so only this last-step write is
    # flushed (earlier steps intentionally leave the block untouched).
    @pl.when(j == nj - 1)
    def _():
        r = lax.broadcasted_iota(jnp.int32, num_ref.shape, 0)
        l = lax.broadcasted_iota(jnp.int32, num_ref.shape, 1)
        is00 = (r == 0) & (l == 0)
        num_ref[...] = jnp.where(is00, jnp.sum(num_acc[...]), 0.0)
        den_ref[...] = jnp.where(is00, jnp.sum(den_acc[...]), 0.0)


def focal_loss(x, target, weight=None, gamma=2, tile_n=None):
    """Focal loss. x: [N, C] float; target: [N] int; weight: [C] float or None."""
    N, C = x.shape
    num_splits, ws_budget, vmem_limit = _chip_config()

    if weight is None:
        weight = jnp.ones((C,), jnp.float32)
    itemsize = jnp.dtype(x.dtype).itemsize
    if tile_n is None:
        tile_n = _pick_tile_n(N, C, itemsize, num_splits, ws_budget)
    tile_n = max(_ROW_ROUND, (int(tile_n) // _ROW_ROUND) * _ROW_ROUND)

    tiles = -(-N // tile_n)
    grid_j = -(-tiles // num_splits)
    n_pad = num_splits * grid_j * tile_n
    if n_pad != N:
        x = jnp.pad(x, ((0, n_pad - N), (0, 0)))
        target = jnp.pad(target, (0, n_pad - N))
    tgt2d = target.reshape(n_pad, 1).astype(jnp.int32)
    w2d = jnp.asarray(weight).reshape(1, C).astype(jnp.float32)

    kernel = functools.partial(
        _focal_loss_kernel, gamma=gamma, n_valid=N, tile_n=tile_n)

    cost = pl.CostEstimate(
        flops=8 * n_pad * C,
        transcendentals=n_pad * C + 3 * n_pad,
        bytes_accessed=n_pad * C * itemsize + n_pad * 4 + C * 4
                       + 2 * num_splits * 8 * 128 * 4,
    )

    num, den = pl.pallas_call(
        kernel,
        out_shape=(
            jax.ShapeDtypeStruct((num_splits * 8, 128), jnp.float32),
            jax.ShapeDtypeStruct((num_splits * 8, 128), jnp.float32),
        ),
        grid_spec=pltpu.PrefetchScalarGridSpec(
            num_scalar_prefetch=0,
            grid=(num_splits, grid_j),
            in_specs=[
                pl.BlockSpec((tile_n, C), lambda c, j: (c * grid_j + j, 0)),
                pl.BlockSpec((tile_n, 1), lambda c, j: (c * grid_j + j, 0)),
                pl.BlockSpec((1, C), lambda c, j: (0, 0)),
            ],
            out_specs=[
                pl.BlockSpec((8, 128), lambda c, j: (c, 0)),
                pl.BlockSpec((8, 128), lambda c, j: (c, 0)),
            ],
            scratch_shapes=[
                pltpu.VMEM((tile_n, 1), jnp.float32),
                pltpu.VMEM((tile_n, 1), jnp.float32),
            ],
        ),
        compiler_params=pltpu.CompilerParams(
            dimension_semantics=("parallel", "arbitrary"),
            vmem_limit_bytes=vmem_limit,
        ),
        cost_estimate=cost,
    )(x, tgt2d, w2d)

    # Only the [c*8, 0] entries are non-zero; summing everything is exact.
    return (jnp.sum(num) / jnp.sum(den)).astype(jnp.float32)


def _focal_loss_ref(x, target, weight=None, gamma=2):
    """Pure-JAX reference mirroring the PyTorch module."""
    x = x.astype(jnp.float32)
    logpt = jax.nn.log_softmax(x, axis=1)
    pt = jnp.exp(logpt)
    fl = ((1.0 - pt) ** gamma) * logpt
    N, C = x.shape
    if weight is None:
        weight = jnp.ones((C,), jnp.float32)
    sel = fl[jnp.arange(N), target]
    w_sel = weight[target]
    return jnp.sum(-w_sel * sel) / jnp.sum(w_sel)


if __name__ == "__main__":
    key = jax.random.PRNGKey(0)
    k1, k2, k3, k4, k5 = jax.random.split(key, 5)

    # Test 1: weight=None, f32 logits.
    N, C = 16, 32
    x = jax.random.normal(k1, (N, C), dtype=jnp.float32)
    target = jax.random.randint(k2, (N,), 0, C, dtype=jnp.int32)

    loss = jax.block_until_ready(focal_loss(x, target, weight=None, gamma=2))
    ref = _focal_loss_ref(x, target, weight=None, gamma=2)
    assert jnp.allclose(loss, ref, rtol=2e-5, atol=2e-5), (loss, ref)

    # Test 2: class weights, N not a multiple of the row-tile granularity
    # (exercises the padding mask).
    N2, C2 = 19, 32
    x2 = jax.random.normal(k3, (N2, C2), dtype=jnp.float32)
    target2 = jax.random.randint(k4, (N2,), 0, C2, dtype=jnp.int32)
    w2 = jax.random.uniform(k5, (C2,), jnp.float32, minval=0.5, maxval=1.5)

    loss2 = jax.block_until_ready(focal_loss(x2, target2, weight=w2, gamma=2))
    ref2 = _focal_loss_ref(x2, target2, weight=w2, gamma=2)
    assert jnp.allclose(loss2, ref2, rtol=2e-5, atol=2e-5), (loss2, ref2)

    # Test 3: bf16 logits path (halves HBM traffic; math still f32 in-kernel).
    x3 = x2.astype(jnp.bfloat16)
    loss3 = jax.block_until_ready(focal_loss(x3, target2, weight=w2, gamma=2))
    ref3 = _focal_loss_ref(x3, target2, weight=w2, gamma=2)
    assert jnp.allclose(loss3, ref3, rtol=2e-5, atol=2e-5), (loss3, ref3)

    # TODO(synk): for C < 128, fold k = 128 // C rows into the lane axis
    # (present an (N/k, k*C) slab with segmented in-kernel reductions) to
    # recover the 128/C lane-padding loss; gated on small-C being a real
    # workload.

    print("KERNEL_OK")
</pallas_src>

<mosaic_0001>
module attributes {stable_mosaic.version = 11 : i64} {
  func.func @_focal_loss_kernel(%arg0: i32, %arg1: i32, %arg2: memref<32x32xf32, #tpu.memory_space<vmem>>, %arg3: memref<32x1xi32, #tpu.memory_space<vmem>>, %arg4: memref<1x32xf32, #tpu.memory_space<vmem>>, %arg5: memref<8x128xf32, #tpu.memory_space<vmem>>, %arg6: memref<8x128xf32, #tpu.memory_space<vmem>>, %arg7: memref<32x1xf32, #tpu.memory_space<vmem>>, %arg8: memref<32x1xf32, #tpu.memory_space<vmem>>) attributes {dimension_semantics = [#tpu.dimension_semantics<parallel>, #tpu.dimension_semantics<arbitrary>], iteration_bounds = array<i64: 2, 1>, scalar_prefetch = 0 : i64, scratch_operands = 2 : i64, tpu.core_type = #tpu.core_type<tc>, window_params = [{transform_indices = @transform_0, window_bounds = array<i64: 32, 32>}, {transform_indices = @transform_1, window_bounds = array<i64: 32, 1>}, {pipeline_mode = #tpu.pipeline_mode<synchronous>, transform_indices = @transform_2, window_bounds = array<i64: 1, 32>}, {transform_indices = @transform_3, window_bounds = array<i64: 8, 128>}, {transform_indices = @transform_4, window_bounds = array<i64: 8, 128>}]} {
    %c0_i32 = arith.constant 0 : i32
    %0 = arith.cmpi eq, %arg1, %c0_i32 : i32
    %1 = arith.extui %0 : i1 to i32
    %c0_i32_0 = arith.constant 0 : i32
    %2 = arith.cmpi ne, %1, %c0_i32_0 : i32
    scf.if %2 {
      %cst_23 = arith.constant 0.000000e+00 : f32
      %56 = vector.broadcast %cst_23 : f32 to vector<32x1xf32>
      %c0_24 = arith.constant 0 : index
      %c0_25 = arith.constant 0 : index
      %57 = vector.load %arg7[%c0_24, %c0_25] : memref<32x1xf32, #tpu.memory_space<vmem>>, vector<32x1xf32>
      tpu.vector_store %arg7[%c0_24, %c0_25], %56 {strides = array<i32>} : memref<32x1xf32, #tpu.memory_space<vmem>>, vector<32x1xf32>,
      %cst_26 = arith.constant 0.000000e+00 : f32
      %58 = vector.broadcast %cst_26 : f32 to vector<32x1xf32>
      %c0_27 = arith.constant 0 : index
      %c0_28 = arith.constant 0 : index
      %59 = vector.load %arg8[%c0_27, %c0_28] : memref<32x1xf32, #tpu.memory_space<vmem>>, vector<32x1xf32>
      tpu.vector_store %arg8[%c0_27, %c0_28], %58 {strides = array<i32>} : memref<32x1xf32, #tpu.memory_space<vmem>>, vector<32x1xf32>,
    } else {
    }
    %c0 = arith.constant 0 : index
    %c0_1 = arith.constant 0 : index
    %3 = vector.load %arg2[%c0, %c0_1] : memref<32x32xf32, #tpu.memory_space<vmem>>, vector<32x32xf32>
    %cst = arith.constant dense<0xFF800000> : vector<32xf32>
    %4 = vector.multi_reduction <maximumf>, %3, %cst [1] : vector<32x32xf32> to vector<32xf32>
    %5 = vector.shape_cast %4 : vector<32xf32> to vector<32x1xf32>
    %6 = vector.broadcast %5 : vector<32x1xf32> to vector<32x32xf32>
    %7 = arith.subf %3, %6 : vector<32x32xf32>
    %8 = math.exp %7 : vector<32x32xf32>
    %cst_2 = arith.constant dense<0.000000e+00> : vector<32xf32>
    %9 = vector.multi_reduction <add>, %8, %cst_2 [1] : vector<32x32xf32> to vector<32xf32>
    %10 = vector.shape_cast %9 : vector<32xf32> to vector<32x1xf32>
    %11 = math.log %10 : vector<32x1xf32>
    %c0_3 = arith.constant 0 : index
    %c0_4 = arith.constant 0 : index
    %12 = vector.load %arg3[%c0_3, %c0_4] : memref<32x1xi32, #tpu.memory_space<vmem>>, vector<32x1xi32>
    %13 = tpu.iota {dimensions = array<i32: 1>} : vector<32x32xi32>
    %14 = vector.broadcast %12 : vector<32x1xi32> to vector<32x32xi32>
    %15 = arith.cmpi eq, %13, %14 : vector<32x32xi32>
    %cst_5 = arith.constant 0.000000e+00 : f32
    %16 = vector.broadcast %cst_5 : f32 to vector<32x32xf32>
    %17 = arith.select %15, %7, %16 : vector<32x32xi1>, vector<32x32xf32>
    %cst_6 = arith.constant dense<0.000000e+00> : vector<32xf32>
    %18 = vector.multi_reduction <add>, %17, %cst_6 [1] : vector<32x32xf32> to vector<32xf32>
    %19 = vector.shape_cast %18 : vector<32xf32> to vector<32x1xf32>
    %20 = arith.subf %19, %11 : vector<32x1xf32>
    %c0_7 = arith.constant 0 : index
    %c0_8 = arith.constant 0 : index
    %21 = vector.load %arg4[%c0_7, %c0_8] : memref<1x32xf32, #tpu.memory_space<vmem>>, vector<1x32xf32>
    %cst_9 = arith.constant 0.000000e+00 : f32
    %22 = vector.shape_cast %21 : vector<1x32xf32> to vector<1x32xf32>
    %23 = vector.broadcast %22 : vector<1x32xf32> to vector<32x32xf32>
    %24 = vector.broadcast %cst_9 : f32 to vector<32x32xf32>
    %25 = arith.select %15, %23, %24 : vector<32x32xi1>, vector<32x32xf32>
    %cst_10 = arith.constant dense<0.000000e+00> : vector<32xf32>
    %26 = vector.multi_reduction <add>, %25, %cst_10 [1] : vector<32x32xf32> to vector<32xf32>
    %27 = vector.shape_cast %26 : vector<32xf32> to vector<32x1xf32>
    %c1_i32 = arith.constant 1 : i32
    %28 = arith.muli %arg0, %c1_i32 : i32
    %29 = arith.addi %28, %arg1 : i32
    %c32_i32 = arith.constant 32 : i32
    %30 = arith.muli %29, %c32_i32 : i32
    %31 = tpu.iota {dimensions = array<i32: 0>} : vector<32x1xi32>
    %32 = vector.broadcast %30 : i32 to vector<32x1xi32>
    %33 = arith.addi %32, %31 : vector<32x1xi32>
    %c16_i32 = arith.constant 16 : i32
    %34 = vector.broadcast %c16_i32 : i32 to vector<32x1xi32>
    %35 = arith.cmpi slt, %33, %34 : vector<32x1xi32>
    %36 = arith.extui %35 : vector<32x1xi1> to vector<32x1xi32>
    %37 = arith.sitofp %36 : vector<32x1xi32> to vector<32x1xf32>
    %38 = arith.mulf %27, %37 : vector<32x1xf32>
    %39 = math.exp %20 : vector<32x1xf32>
    %cst_11 = arith.constant 1.000000e+00 : f32
    %40 = vector.broadcast %cst_11 : f32 to vector<32x1xf32>
    %41 = arith.subf %40, %39 : vector<32x1xf32>
    %42 = arith.mulf %41, %41 : vector<32x1xf32>
    %43 = arith.mulf %42, %20 : vector<32x1xf32>
    %c0_12 = arith.constant 0 : index
    %c0_13 = arith.constant 0 : index
    %44 = vector.load %arg7[%c0_12, %c0_13] : memref<32x1xf32, #tpu.memory_space<vmem>>, vector<32x1xf32>
    %cst_14 = arith.constant 0.000000e+00 : f32
    %45 = vector.broadcast %cst_14 : f32 to vector<32x1xf32>
    %46 = arith.subf %45, %38 : vector<32x1xf32>
    %47 = arith.mulf %46, %43 : vector<32x1xf32>
    %48 = arith.addf %44, %47 : vector<32x1xf32>
    %c0_15 = arith.constant 0 : index
    %c0_16 = arith.constant 0 : index
    %49 = vector.load %arg7[%c0_15, %c0_16] : memref<32x1xf32, #tpu.memory_space<vmem>>, vector<32x1xf32>
    tpu.vector_store %arg7[%c0_15, %c0_16], %48 {strides = array<i32>} : memref<32x1xf32, #tpu.memory_space<vmem>>, vector<32x1xf32>,
    %c0_17 = arith.constant 0 : index
    %c0_18 = arith.constant 0 : index
    %50 = vector.load %arg8[%c0_17, %c0_18] : memref<32x1xf32, #tpu.memory_space<vmem>>, vector<32x1xf32>
    %51 = arith.addf %50, %38 : vector<32x1xf32>
    %c0_19 = arith.constant 0 : index
    %c0_20 = arith.constant 0 : index
    %52 = vector.load %arg8[%c0_19, %c0_20] : memref<32x1xf32, #tpu.memory_space<vmem>>, vector<32x1xf32>
    tpu.vector_store %arg8[%c0_19, %c0_20], %51 {strides = array<i32>} : memref<32x1xf32, #tpu.memory_space<vmem>>, vector<32x1xf32>,
    %c0_i32_21 = arith.constant 0 : i32
    %53 = arith.cmpi eq, %arg1, %c0_i32_21 : i32
    %54 = arith.extui %53 : i1 to i32
    %c0_i32_22 = arith.constant 0 : i32
    %55 = arith.cmpi ne, %54, %c0_i32_22 : i32
    scf.if %55 {
      %56 = tpu.iota {dimensions = array<i32: 0>} : vector<8x128xi32>
      %57 = tpu.iota {dimensions = array<i32: 1>} : vector<8x128xi32>
      %c0_i32_23 = arith.constant 0 : i32
      %58 = vector.broadcast %c0_i32_23 : i32 to vector<8x128xi32>
      %59 = arith.cmpi eq, %56, %58 : vector<8x128xi32>
      %c0_i32_24 = arith.constant 0 : i32
      %60 = vector.broadcast %c0_i32_24 : i32 to vector<8x128xi32>
      %61 = arith.cmpi eq, %57, %60 : vector<8x128xi32>
      %62 = arith.andi %59, %61 : vector<8x128xi1>
      %c0_25 = arith.constant 0 : index
      %c0_26 = arith.constant 0 : index
      %63 = vector.load %arg7[%c0_25, %c0_26] : memref<32x1xf32, #tpu.memory_space<vmem>>, vector<32x1xf32>
      %64 = vector.shape_cast %63 : vector<32x1xf32> to vector<1x32x1xf32>
      %cst_27 = arith.constant dense<0.000000e+00> : vector<1xf32>
      %65 = vector.multi_reduction <add>, %64, %cst_27 [1, 2] : vector<1x32x1xf32> to vector<1xf32>
      %66 = vector.shape_cast %65 : vector<1xf32> to vector<1x1x1xf32>
      %67 = vector.extract %66[0, 0, 0] : f32 from vector<1x1x1xf32>
      %cst_28 = arith.constant 0.000000e+00 : f32
      %68 = vector.broadcast %67 : f32 to vector<8x128xf32>
      %69 = vector.broadcast %cst_28 : f32 to vector<8x128xf32>
      %70 = arith.select %62, %68, %69 : vector<8x128xi1>, vector<8x128xf32>
      %c0_29 = arith.constant 0 : index
      %c0_30 = arith.constant 0 : index
      %71 = vector.load %arg5[%c0_29, %c0_30] : memref<8x128xf32, #tpu.memory_space<vmem>>, vector<8x128xf32>
      tpu.vector_store %arg5[%c0_29, %c0_30], %70 {strides = array<i32>} : memref<8x128xf32, #tpu.memory_space<vmem>>, vector<8x128xf32>,
      %c0_31 = arith.constant 0 : index
      %c0_32 = arith.constant 0 : index
      %72 = vector.load %arg8[%c0_31, %c0_32] : memref<32x1xf32, #tpu.memory_space<vmem>>, vector<32x1xf32>
      %73 = vector.shape_cast %72 : vector<32x1xf32> to vector<1x32x1xf32>
      %cst_33 = arith.constant dense<0.000000e+00> : vector<1xf32>
      %74 = vector.multi_reduction <add>, %73, %cst_33 [1, 2] : vector<1x32x1xf32> to vector<1xf32>
      %75 = vector.shape_cast %74 : vector<1xf32> to vector<1x1x1xf32>
      %76 = vector.extract %75[0, 0, 0] : f32 from vector<1x1x1xf32>
      %cst_34 = arith.constant 0.000000e+00 : f32
      %77 = vector.broadcast %76 : f32 to vector<8x128xf32>
      %78 = vector.broadcast %cst_34 : f32 to vector<8x128xf32>
      %79 = arith.select %62, %77, %78 : vector<8x128xi1>, vector<8x128xf32>
      %c0_35 = arith.constant 0 : index
      %c0_36 = arith.constant 0 : index
      %80 = vector.load %arg6[%c0_35, %c0_36] : memref<8x128xf32, #tpu.memory_space<vmem>>, vector<8x128xf32>
      tpu.vector_store %arg6[%c0_35, %c0_36], %79 {strides = array<i32>} : memref<8x128xf32, #tpu.memory_space<vmem>>, vector<8x128xf32>,
    } else {
    }
    return
  }
  func.func @transform_0(%arg0: i32, %arg1: i32) -> (i32, i32) {
    %c1_i32 = arith.constant 1 : i32
    %0 = arith.muli %arg0, %c1_i32 : i32
    %1 = arith.addi %0, %arg1 : i32
    %c0_i32 = arith.constant 0 : i32
    %c0_i32_0 = arith.constant 0 : i32
    return %1, %c0_i32 : i32, i32
  }
  func.func @transform_1(%arg0: i32, %arg1: i32) -> (i32, i32) {
    %c1_i32 = arith.constant 1 : i32
    %0 = arith.muli %arg0, %c1_i32 : i32
    %1 = arith.addi %0, %arg1 : i32
    %c0_i32 = arith.constant 0 : i32
    %c0_i32_0 = arith.constant 0 : i32
    return %1, %c0_i32 : i32, i32
  }
  func.func @transform_2(%arg0: i32, %arg1: i32) -> (i32, i32) {
    %c0_i32 = arith.constant 0 : i32
    %c0_i32_0 = arith.constant 0 : i32
    %c0_i32_1 = arith.constant 0 : i32
    return %c0_i32, %c0_i32_0 : i32, i32
  }
  func.func @transform_3(%arg0: i32, %arg1: i32) -> (i32, i32) {
    %c0_i32 = arith.constant 0 : i32
    %c0_i32_0 = arith.constant 0 : i32
    return %arg0, %c0_i32 : i32, i32
  }
  func.func @transform_4(%arg0: i32, %arg1: i32) -> (i32, i32) {
    %c0_i32 = arith.constant 0 : i32
    %c0_i32_0 = arith.constant 0 : i32
    return %arg0, %c0_i32 : i32, i32
  }
}

</mosaic_0001>

<bundles_post_ra>
// kernel: tpu_custom_call.1
= control target key start
LH: loop header
LB: loop body
LE: loop exit
PB: predicated region body
PF: predicated region fallthrough
CT: control target
= control target key end

     0   :  { %10 = vsyncpa [#allocation5], 0  ;;  %s1147_s0 = inlined_call_operand.vmem [shape: f32[64,32], index: 0, kind: input, shape index: {}]   ;;  %s1148_s1 = inlined_call_operand.vmem [shape: s32[64,1], index: 1, kind: input, shape index: {}]   ;;  %s1149_s2 = inlined_call_operand.vmem [shape: f32[1,32], index: 2, kind: input, shape index: {}]   ;;  %s1150_s3 = inlined_call_operand.hbm [shape: f32[16,128], index: 3, kind: output, shape index: {0}]   ;;  %s1151_s4 = inlined_call_operand.hbm [shape: f32[16,128], index: 4, kind: output, shape index: {1}]  }
   0x1   :  { %12 = vsyncpa [#allocation5 + $0x1], 0 }
   0x2   :  { %13 = vsyncpa [#allocation7], 0 }
   0x3   :  { %15 = vsyncpa [#allocation7 + $0x1], 0  ;;  %s912_s15 = smov 0   ;;  %s914_s16 = smov 0  }
   0x4   :  { %s916_s17 = smov 0   ;;  %s918_s18 = smov 0  }
   0x5   :  { %s920_s19 = smov 0   ;;  %s922_s20 = smov 0  }
   0x6 LB: > { %s660_s21 = sadd.s32 4294967295, %s881_s20   ;;  %s661_s22 = sadd.s32 4294967294, %s881_s20   ;;  %s881_s20 = sphi %s922_s20, %s21_s20   ;;  %s877_s19 = sphi %s920_s19, %s1158_s19   ;;  %s873_s18 = sphi %s918_s18, %s1157_s18   ;;  %s869_s17 = sphi %s916_s17, %s1156_s17   ;;  %s865_s16 = sphi %s914_s16, %s1155_s16   ;;  %s861_s15 = sphi %s912_s15, %s1154_s15  }
   0x7   : > { %s33_s23 = sadd.s32 1, %s877_s19  ;;  %s117_s24 = sadd.s32 1, %s869_s17 }
   0x8   : > { %p35_p0 = scmp.ge.s32.totalorder %s33_s23, 2  ;;  %p127_p1 = scmp.ne.s32.totalorder %s869_s17, %s865_s16 }
   0x9   : > { %p128_p2 = scmp.eq.s32.totalorder %s660_s21, 1  ;;  %p133_p3 = scmp.ne.s32.totalorder %s865_s16, %s861_s15 }
   0xa   : > { %s1160_s23 = smov (%p35_p0, %s33_s23), 0  ;;  %p134_p5 = scmp.eq.s32.totalorder %s661_s22, 1 }
   0xb   : > { %p952_p4 = por %p128_p2, %p127_p1  ;;  %s114_s26 = ssub.s32 %s877_s19, %s1160_s23 }
   0xc   : > { %p664_p6 = scmp.ge.s32.totalorder %s881_s20, 1  ;;  %p115_p7 = scmp.eq.s32.totalorder %s114_s26, 0 }
   0xd   : > { %p959_p8 = por %p134_p5, %p133_p3  ;;  %p203_p9 = scmp.lt.s32.totalorder %s881_s20, 3 }
   0xe   : > { %s965_s28 = scalar_select %p115_p7, %s869_s17, %s117_s24  }
   0xf   : > { %p204_p10 = pnand %p664_p6, %p203_p9 }
  0x10   : > { %s667_s29 = sshll.u32 (!%p204_p10), %s873_s18, 2  ;;  %s672_s13 = sshll.u32 (!%p204_p10), %s873_s18, 5 }
  0x11   : > { %207 = sbr.rel (%p204_p10) target bundleno = 625 (0x271), region = 32  ;;  %p243_p11 = scmp.lt.s32.totalorder (!%p204_p10), %s667_s29, 7 }
  0x12   : > { %s1063_s14 = sand.u32 (!%p204_p10), 1, %s865_s16   ;;  %s679_s22 = sshll.u32 (!%p204_p10), %s873_s18, 7 }
  0x13   : > { %s665_s21 = sshll.u32 (!%p204_p10), %s1063_s14, 3  ;;  %s1072_s5 = scalar_lea.hbm (!%p204_p10), %s1150_s3, %s679_s22 }
  0x14   : > { %s233_s24 = scalar_lea.vmem (!%p204_p10), [#allocation4], %s665_s21  ;;  %s240_s6 = scalar_lea.vmem (!%p204_p10), [#allocation6], %s665_s21 }
  0x15   : > { %s536_s26 = sshll.u32 (!%p204_p10), %s233_s24, 4  ;;  %s1079_s11 = scalar_lea.hbm (!%p204_p10), %s1151_s4, %s679_s22  ;;  %s1074_s26 = int_to_ptr.vmem [resolvable:$true] %s536_s26 }
  0x16   : > { %v883_v0 = vmov 0   ;;  %s1162_s29 = smov (!%p243_p11, %s667_s29), 7  ;;  %vm274_vm0 = vcmask 261120   ;;  %v323_v26 = vlaneseq  ;;  %v671_v37 = vld [vmem:[%s1149_s2] ss:$0 sm:$0xff]  ;;  %vm261_vm5 = vcmask 7168  }
  0x17   : > { %750 = vset.pattern.permute.xlu1 %v883_v0  ;;  %749 = vset.pattern.permute.xlu0 %v883_v0  ;;  %s668_s30 = sshll.u32 %s1162_s29, 3  ;;  %v884_v53 = vmov 0.0   ;;  %v391_v59 = vstv %s672_s13  ;;  %s518_s12 = scalar_lea.sflag [#allocation5], %s1063_s14 }
  0x18   : > { %s246_s7 = scalar_lea.vmem %s1147_s0, %s668_s30  ;;  %s254_s10 = scalar_lea.vmem %s1148_s1, %s668_s30  ;;  %v978_v30 = vand.u32 127, %v323_v26  ;;  %262 = vst.msk [vmem:[#allocation2] sm:$0xff] %vm261_vm5, %v884_v53  ;;  %266 = vst.msk [vmem:[#allocation3] sm:$0xff] %vm261_vm5, %v884_v53  ;;  %v1028_v57 = vshrl.u32 %v323_v26, 7 }
  0x19   : > { %v272_v1 = vld [vmem:[%s246_s7 + $0x10] sm:$0xff]  ;;  %v270_v2 = vld [vmem:[%s246_s7] sm:$0xff]  ;;  %v273_v3 = vld [vmem:[%s246_s7 + $0x18] sm:$0xff]  ;;  %263 = vst.msk [vmem:[#allocation2 + $0x8] sm:$0xff] %vm261_vm5, %v884_v53  ;;  %s775_s13 = scalar_lea.vmem %s1074_s26, 128  ;;  %s885_s21 = smov [#allocation4]  }
  0x1a   : > { %v281_v4 = vsel %vm274_vm0, %v272_v1, -inf  ;;  %v275_v5 = vsel %vm274_vm0, %v270_v2, -inf  ;;  %v271_v6 = vld [vmem:[%s246_s7 + $0x8] sm:$0xff]  ;;  %v284_v7 = vsel %vm274_vm0, %v273_v3, -inf  ;;  %v321_v10 = vld [vmem:[%s254_s10 + $0x10] sm:$0xff]  ;;  %v319_v11 = vld [vmem:[%s254_s10] sm:$0xff]  ;;  %v392_v60 = vadd.s32 %v391_v59, %v1028_v57  ;;  %p776_p12 = scmp.ne.s32.totalorder %s1074_s26, %s775_s13 }
  0x1b   : > { %282 = vmax.xlane.f32.xlu1 %v281_v4  ;;  %276 = vmax.xlane.f32.xlu0 %v275_v5  ;;  %v278_v8 = vsel %vm274_vm0, %v271_v6, -inf  ;;  %v320_v9 = vld [vmem:[%s254_s10 + $0x8] sm:$0xff]  ;;  %v322_v12 = vld [vmem:[%s254_s10 + $0x18] sm:$0xff]  ;;  %264 = vst.msk [vmem:[#allocation2 + $0x10] sm:$0xff] %vm261_vm5, %v884_v53  ;;  %265 = vst.msk [vmem:[#allocation2 + $0x18] sm:$0xff] %vm261_vm5, %v884_v53  ;;  %v389_v61 = vadd.s32 16, %v1028_v57 }
  0x1c   : > { %267 = vst.msk [vmem:[#allocation3 + $0x8] sm:$0xff] %vm261_vm5, %v884_v53  ;;  %268 = vst.msk [vmem:[#allocation3 + $0x10] sm:$0xff] %vm261_vm5, %v884_v53  ;;  %vm396_vm6 = vcmp.lt.s32.totalorder %v392_v60, 16  ;;  %v388_v4 = vadd.s32 8, %v1028_v57  ;;  %vm468_vm10 = vcmp.eq.s32.totalorder %v1028_v57, 0  ;;  %vm469_vm11 = vcmp.eq.s32.totalorder %v978_v30, 0  ;;  %p777_p13 = pnand %p776_p12, %p952_p4 }
  0x1d   : > { %269 = vst.msk [vmem:[#allocation3 + $0x18] sm:$0xff] %vm261_vm5, %v884_v53  ;;  %v394_v0 = vadd.s32 %v391_v59, %v389_v61  ;;  %vm470_vm12 = vmand %vm468_vm10, %vm469_vm11  ;;  %s549_s7 = sshll.u32 %s240_s6, 4  ;;  %s779_s29 = sshll.u32 %s885_s21, 4  ;;  %s1081_s7 = int_to_ptr.vmem [resolvable:$true] %s549_s7  ;;  %s780_s29 = int_to_ptr.vmem [resolvable:$false] %s779_s29 }
  0x1e   : > { %p778_p0 = pneg %p777_p13  ;;  %s781_s30 = scalar_lea.vmem %s780_s29, 256 }
  0x1f   : > { %285 = vmax.xlane.f32.xlu1 %v284_v7  ;;  %279 = vmax.xlane.f32.xlu0 %v278_v8  ;;  %vm398_vm7 = vcmp.lt.s32.totalorder %v394_v0, 16  ;;  %p782_p1 = scmp.lt.s32.totalorder %s1074_s26, %s780_s29  ;;  %p783_p2 = scmp.lt.s32.totalorder %s781_s30, %s775_s13 }
  0x21   : > { %p784_p3 = por %p783_p2, %p782_p1 }
  0x23   : > { %p785_p5 = pnand %p784_p3, %p778_p0 }
  0x30   : > { %329 = vperm.xlu1 %750, %v320_v9  }
  0x34   : > { %332 = vperm.xlu1 %750, %v321_v10   ;;  %v675_v10 = vsel %vm398_vm7, 1.0, %v884_v53 }
  0x35   : > { %326 = vperm.xlu0 %749, %v319_v11   ;;  %v393_v11 = vadd.s32 %v391_v59, %v388_v4 }
  0x37   : > { %vm397_vm8 = vcmp.lt.s32.totalorder %v393_v11, 16 }
  0x38   : > { %335 = vperm.xlu1 %750, %v322_v12  }
  0xa4   : > { %v283_v13 = vpop.xlane.xlu1 %282  ;;  %v277_v14 = vpop.xlane.xlu0 %276 }
  0xa5   : > { %v289_v15 = vsub.f32 %v272_v1, %v283_v13  ;;  %v287_v16 = vsub.f32 %v270_v2, %v277_v14  ;;  %v390_v14 = vadd.s32 24, %v1028_v57 }
  0xa7   : > { %v295_v17 = vmul.f32 1.442695, %v289_v15  ;;  %v291_v18 = vmul.f32 1.442695, %v287_v16 }
  0xa8   : > { %v286_v19 = vpop.xlane.xlu1 %285  ;;  %v280_v20 = vpop.xlane.xlu0 %279 }
  0xa9   : > { %751 = vpow2.f32 %v295_v17  ;;  %v290_v21 = vsub.f32 %v273_v3, %v286_v19  ;;  %v288_v22 = vsub.f32 %v271_v6, %v280_v20  ;;  %v673_v3 = vsel %vm396_vm6, 1.0, %v884_v53  ;;  %v453_v6 = vld [vmem:[#allocation3] sm:$0xff] }
  0xaa   : > { %753 = vpow2.f32 %v291_v18 }
  0xab   : > { %v297_v23 = vmul.f32 1.442695, %v290_v21  ;;  %v293_v24 = vmul.f32 1.442695, %v288_v22 }
  0xac   : > { %v330_v25 = vpop.permute.xlu1 %329 }
  0xad   : > { %755 = vpow2.f32 %v297_v23  ;;  %vm338_vm3 = vcmp.eq.s32.totalorder %v978_v30, %v330_v25  ;;  %v395_v25 = vadd.s32 %v391_v59, %v390_v14 }
  0xae   : > { %757 = vpow2.f32 %v293_v24  ;;  %v342_v47 = vsel %vm338_vm3, %v288_v22, 0.0  ;;  %v369_v52 = vsel %vm338_vm3, %v671_v37, 0.0 }
  0xaf   : > { %v348_v49 = vsel %vm274_vm0, %v342_v47, 0.0  ;;  %v375_v54 = vsel %vm274_vm0, %v369_v52, 0.0  ;;  %vm399_vm9 = vcmp.lt.s32.totalorder %v395_v25, 16  ;;  %v435_v25 = vld [vmem:[#allocation2 + $0x18] sm:$0xff] }
  0xb0   : > { %v333_v29 = vpop.permute.xlu1 %332  ;;  %v327_v35 = vpop.permute.xlu0 %326 }
  0xb1   : > { %vm339_vm1 = vcmp.eq.s32.totalorder %v978_v30, %v333_v29  ;;  %vm337_vm2 = vcmp.eq.s32.totalorder %v978_v30, %v327_v35 }
  0xb2   : > { %v343_v38 = vsel %vm339_vm1, %v289_v15, 0.0  ;;  %v368_v40 = vsel %vm337_vm2, %v671_v37, 0.0  ;;  %v341_v42 = vsel %vm337_vm2, %v287_v16, 0.0  ;;  %v370_v45 = vsel %vm339_vm1, %v671_v37, 0.0  ;;  %v455_v16 = vld [vmem:[#allocation3 + $0x10] sm:$0xff] }
  0xb3   : > { %v351_v41 = vsel %vm274_vm0, %v343_v38, 0.0  ;;  %v372_v43 = vsel %vm274_vm0, %v368_v40, 0.0  ;;  %v345_v46 = vsel %vm274_vm0, %v341_v42, 0.0  ;;  %v378_v48 = vsel %vm274_vm0, %v370_v45, 0.0 }
  0xb4   : > { %v336_v44 = vpop.permute.xlu1 %335  ;;  %v676_v40 = vsel %vm399_vm9, 1.0, %v884_v53 }
  0xb5   : > { %vm340_vm4 = vcmp.eq.s32.totalorder %v978_v30, %v336_v44 }
  0xb6   : > { %v752_v27 = vpop.eup %751  ;;  %v344_v50 = vsel %vm340_vm4, %v290_v21, 0.0  ;;  %v371_v55 = vsel %vm340_vm4, %v671_v37, 0.0 }
  0xb7   : > { %v754_v28 = vpop.eup %753  ;;  %v305_v33 = vsel %vm274_vm0, %v752_v27, 0.0  ;;  %v354_v51 = vsel %vm274_vm0, %v344_v50, 0.0  ;;  %v381_v56 = vsel %vm274_vm0, %v371_v55, 0.0 }
  0xb8   : > { %v299_v31 = vsel %vm274_vm0, %v754_v28, 0.0 }
  0xb9   : > { %300 = vadd.xlane.f32.xlu1 %v299_v31 }
  0xba   : > { %v756_v32 = vpop.eup %755 }
  0xbb   : > { %v758_v34 = vpop.eup %757  ;;  %v308_v39 = vsel %vm274_vm0, %v756_v32, 0.0  ;;  %v674_v32 = vsel %vm397_vm8, 1.0, %v884_v53 }
  0xbc   : > { %v302_v36 = vsel %vm274_vm0, %v758_v34, 0.0 }
  0xbd   : > { %306 = vadd.xlane.f32.xlu1 %v305_v33  ;;  %303 = vadd.xlane.f32.xlu0 %v302_v36  ;;  %v454_v36 = vld [vmem:[#allocation3 + $0x8] sm:$0xff] }
  0xc1   : > { %309 = vadd.xlane.f32.xlu1 %v308_v39  ;;  %352 = vadd.xlane.f32.xlu0 %v351_v41 }
  0xc5   : > { %373 = vadd.xlane.f32.xlu0 %v372_v43  ;;  %346 = vadd.xlane.f32.xlu1 %v345_v46  ;;  %v456_v43 = vld [vmem:[#allocation3 + $0x18] sm:$0xff] }
  0xc9   : > { %379 = vadd.xlane.f32.xlu0 %v378_v48  ;;  %349 = vadd.xlane.f32.xlu1 %v348_v49 }
  0xcd   : > { %355 = vadd.xlane.f32.xlu1 %v354_v51 }
  0xd1   : > { %376 = vadd.xlane.f32.xlu1 %v375_v54 }
  0xd5   : > { %382 = vadd.xlane.f32.xlu1 %v381_v56 }
 0x142   : > { %v301_v58 = vpop.xlane.xlu1 %300 }
 0x143   : > { %759 = vlog2.f32 %v301_v58 }
 0x146   : > { %v307_v62 = vpop.xlane.xlu1 %306  ;;  %v304_v63 = vpop.xlane.xlu0 %303 }
 0x147   : > { %761 = vlog2.f32 %v307_v62 }
 0x148   : > { %763 = vlog2.f32 %v304_v63  ;;  %v432_v63 = vld [vmem:[#allocation2] sm:$0xff] }
 0x14a   : > { %v310_v1 = vpop.xlane.xlu1 %309  ;;  %v353_v2 = vpop.xlane.xlu0 %352 }
 0x14b   : > { %765 = vlog2.f32 %v310_v1 }
 0x14e   : > { %v347_v5 = vpop.xlane.xlu1 %346  ;;  %v374_v7 = vpop.xlane.xlu0 %373 }
 0x14f   : > { %v1034_v8 = vmul.f32 %v673_v3, %v374_v7 }
 0x150   : > { %v760_v9 = vpop.eup %759 }
 0x151   : > { %v312_v12 = vmul.f32 0.6931472, %v760_v9  ;;  %v457_v13 = vadd.f32 %v453_v6, %v1034_v8  ;;  %v436_v61 = vsub.f32 0.0, %v1034_v8  ;;  %v434_v8 = vld [vmem:[#allocation2 + $0x10] sm:$0xff] }
 0x152   : > { %v350_v15 = vpop.xlane.xlu1 %349  ;;  %v380_v17 = vpop.xlane.xlu0 %379 }
 0x153   : > { %v357_v18 = vsub.f32 %v347_v5, %v312_v12  ;;  %461 = vst.msk [vmem:[#allocation3] sm:$0xff] %vm261_vm5, %v457_v13  ;;  %v1040_v19 = vmul.f32 %v675_v10, %v380_v17 }
 0x154   : > { %v762_v20 = vpop.eup %761 }
 0x155   : > { %v764_v21 = vpop.eup %763  ;;  %v316_v22 = vmul.f32 0.6931472, %v762_v20  ;;  %v412_v23 = vmul.f32 1.442695, %v357_v18  ;;  %v459_v24 = vadd.f32 %v455_v16, %v1040_v19  ;;  %v438_v12 = vsub.f32 0.0, %v1040_v19 }
 0x156   : > { %v314_v26 = vmul.f32 0.6931472, %v764_v21  ;;  %v356_v27 = vpop.xlane.xlu1 %355 }
 0x157   : > { %v359_v28 = vsub.f32 %v353_v2, %v316_v22  ;;  %767 = vpow2.f32 %v412_v23  ;;  %463 = vst.msk [vmem:[#allocation3 + $0x10] sm:$0xff] %vm261_vm5, %v459_v24 }
 0x158   : > { %v766_v29 = vpop.eup %765  ;;  %v358_v31 = vsub.f32 %v350_v15, %v314_v26 }
 0x159   : > { %v416_v33 = vmul.f32 1.442695, %v359_v28  ;;  %v318_v34 = vmul.f32 0.6931472, %v766_v29 }
 0x15a   : > { %v414_v35 = vmul.f32 1.442695, %v358_v31  ;;  %v377_v37 = vpop.xlane.xlu1 %376  ;;  %v494_v48 = vld [vmem:[#allocation3] sm:$0xff] }
 0x15b   : > { %769 = vpow2.f32 %v416_v33  ;;  %v360_v38 = vsub.f32 %v356_v27, %v318_v34  ;;  %v409_v39 = vmul.f32 %v674_v32, %v377_v37  ;;  %v498_v54 = vsel %vm261_vm5, %v494_v48, 0.0 }
 0x15c   : > { %771 = vpow2.f32 %v414_v35 }
 0x15d   : > { %v418_v41 = vmul.f32 1.442695, %v360_v38  ;;  %v458_v42 = vadd.f32 %v454_v36, %v409_v39  ;;  %v437_v15 = vsub.f32 0.0, %v409_v39 }
 0x15e   : > { %v383_v44 = vpop.xlane.xlu1 %382  ;;  %v496_v51 = vld [vmem:[#allocation3 + $0x10] sm:$0xff] }
 0x15f   : > { %773 = vpow2.f32 %v418_v41  ;;  %462 = vst.msk [vmem:[#allocation3 + $0x8] sm:$0xff] %vm261_vm5, %v458_v42  ;;  %v411_v45 = vmul.f32 %v676_v40, %v383_v44  ;;  %v501_v62 = vsel %vm261_vm5, %v496_v51, 0.0 }
 0x161   : > { %v460_v46 = vadd.f32 %v456_v43, %v411_v45  ;;  %v439_v23 = vsub.f32 0.0, %v411_v45 }
 0x163   : > { %464 = vst.msk [vmem:[#allocation3 + $0x18] sm:$0xff] %vm261_vm5, %v460_v46 }
 0x164   : > { %v768_v47 = vpop.eup %767 }
 0x165   : > { %v420_v49 = vsub.f32 1.0, %v768_v47 }
 0x166   : > { %v495_v50 = vld [vmem:[#allocation3 + $0x8] sm:$0xff] }
 0x167   : > { %v424_v52 = vmul.f32 %v420_v49, %v420_v49  ;;  %v499_v53 = vsel %vm261_vm5, %v495_v50, 0.0 }
 0x168   : > { %v770_v55 = vpop.eup %769  ;;  %v500_v56 = vadd.f32 %v499_v53, %v498_v54 }
 0x169   : > { %v772_v58 = vpop.eup %771  ;;  %v422_v59 = vsub.f32 1.0, %v770_v55  ;;  %v428_v60 = vmul.f32 %v424_v52, %v357_v18  ;;  %v433_v18 = vld [vmem:[#allocation2 + $0x8] sm:$0xff] }
 0x16a   : > { %v421_v0 = vsub.f32 1.0, %v772_v58  ;;  %v497_v1 = vld [vmem:[#allocation3 + $0x18] sm:$0xff]  ;;  %v502_v2 = vadd.f32 %v501_v62, %v500_v56 }
 0x16b   : > { %v426_v3 = vmul.f32 %v422_v59, %v422_v59  ;;  %v440_v4 = vmul.f32 %v436_v61, %v428_v60  ;;  %v503_v5 = vsel %vm261_vm5, %v497_v1, 0.0 }
 0x16c   : > { %v774_v6 = vpop.eup %773  ;;  %v425_v7 = vmul.f32 %v421_v0, %v421_v0  ;;  %v504_v9 = vadd.f32 %v503_v5, %v502_v2 }
 0x16d   : > { %v430_v10 = vmul.f32 %v426_v3, %v359_v28  ;;  %v444_v11 = vadd.f32 %v440_v4, %v432_v63  ;;  %v423_v13 = vsub.f32 1.0, %v774_v6 }
 0x16e   : > { %v429_v14 = vmul.f32 %v425_v7, %v358_v31  ;;  %505 = vadd.xlane.f32.xlu1 %v504_v9 }
 0x16f   : > { %449 = vst.msk [vmem:[#allocation2] sm:$0xff] %vm261_vm5, %v444_v11  ;;  %v442_v16 = vmul.f32 %v438_v12, %v430_v10  ;;  %v427_v17 = vmul.f32 %v423_v13, %v423_v13 }
 0x170   : > { %v441_v20 = vmul.f32 %v437_v15, %v429_v14 }
 0x171   : > { %v446_v21 = vadd.f32 %v442_v16, %v434_v8  ;;  %v431_v22 = vmul.f32 %v427_v17, %v360_v38 }
 0x172   : > { %v445_v24 = vadd.f32 %v441_v20, %v433_v18 }
 0x173   : > { %451 = vst.msk [vmem:[#allocation2 + $0x10] sm:$0xff] %vm261_vm5, %v446_v21  ;;  %v443_v26 = vmul.f32 %v439_v23, %v431_v22 }
 0x174   : > { %450 = vst.msk [vmem:[#allocation2 + $0x8] sm:$0xff] %vm261_vm5, %v445_v24 }
 0x175   : > { %v447_v19 = vadd.f32 %v443_v26, %v435_v25 }
 0x176   : > { %v471_v27 = vld [vmem:[#allocation2] sm:$0xff] }
 0x177   : > { %452 = vst.msk [vmem:[#allocation2 + $0x18] sm:$0xff] %vm261_vm5, %v447_v19  ;;  %v475_v31 = vsel %vm261_vm5, %v471_v27, 0.0 }
 0x17a   : > { %v473_v29 = vld [vmem:[#allocation2 + $0x10] sm:$0xff] }
 0x17b   : > { %v472_v28 = vld [vmem:[#allocation2 + $0x8] sm:$0xff]  ;;  %v478_v35 = vsel %vm261_vm5, %v473_v29, 0.0 }
 0x17c   : > { %v476_v32 = vsel %vm261_vm5, %v472_v28, 0.0 }
 0x17d   : > { %v477_v33 = vadd.f32 %v476_v32, %v475_v31 }
 0x17e   : > { %v474_v34 = vld [vmem:[#allocation2 + $0x18] sm:$0xff] }
 0x17f   : > { %v479_v36 = vadd.f32 %v478_v35, %v477_v33  ;;  %v480_v37 = vsel %vm261_vm5, %v474_v34, 0.0 }
 0x181   : > { %v481_v38 = vadd.f32 %v480_v37, %v479_v36 }
 0x183   : > { %482 = vadd.xlane.f32.xlu0 %v481_v38 }
 0x1f7   : > { %v506_v39 = vpop.xlane.xlu1 %505 }
 0x1f8   : > { %v507_v40 = vrot.slane %v506_v39, 4 }
 0x1fa   : > { %v508_v41 = vadd.f32 %v507_v40, %v506_v39 }
 0x1fc   : > { %v509_v42 = vrot.slane %v508_v41, 2 }
 0x1fe   : > { %v510_v46 = vadd.f32 %v509_v42, %v508_v41 }
 0x200   : > { %v511_v49 = vrot.slane %v510_v46, 1 }
 0x202   : > { %v512_v52 = vadd.f32 %v511_v49, %v510_v46 }
 0x20c   : > { %v483_v43 = vpop.xlane.xlu0 %482 }
 0x20d   : > { %v484_v44 = vrot.slane %v483_v43, 4 }
 0x20f   : > { %v485_v45 = vadd.f32 %v484_v44, %v483_v43 }
 0x211   : > { %v486_v47 = vrot.slane %v485_v45, 2 }
 0x213   : > { %v487_v48 = vadd.f32 %v486_v47, %v485_v45 }
 0x215   : > { %v488_v50 = vrot.slane %v487_v48, 1 }
 0x217   : > { %v489_v51 = vadd.f32 %v488_v50, %v487_v48 }
 0x219   : > { %683 = vpush %v489_v51 }
 0x21a   : > { %685 = vpush %v512_v52 }
 0x24a   : > { %s684_s8 = spop %683 }
 0x24b   : > { %v491_v57 = vstv %s684_s8  ;;  %s686_s9 = spop %685 }
 0x24c   : > { %v492_v30 = vsel %vm470_vm12, %v491_v57, 0.0  ;;  %v514_v54 = vstv %s686_s9 }
 0x24d   : > { %493 = vst [vmem:[%s233_s24] sm:$0xff] %v492_v30  ;;  %v515_v53 = vsel %vm470_vm12, %v514_v54, 0.0 }
 0x24e   : > { %516 = vst [vmem:[%s240_s6] sm:$0xff] %v515_v53 }
 0x24f   : > { %788 = shalt.err (!%p785_p5)
}
 0x250   : > { %s789_s22 = scalar_lea.hbm %s1072_s5, 128  ;;  %s793_s8 = scalar_lea.hbm %s1150_s3, 256 }
 0x251   : > { %p790_p6 = scmp.ne.s32.totalorder %s1072_s5, %s789_s22  ;;  %p794_p10 = scmp.lt.s32.totalorder %s1072_s5, %s1150_s3 }
 0x252   : > { %p795_p11 = scmp.lt.s32.totalorder %s793_s8, %s789_s22 }
 0x253   : > { %p791_p7 = pnand %p790_p6, %p952_p4 }
 0x254   : > { %p796_p12 = por %p795_p11, %p794_p10 }
 0x255   : > { %p792_p9 = pneg %p791_p7 }
 0x257   : > { %p797_p13 = pnand %p796_p12, %p792_p9 }
 0x259   : > { %800 = shalt.err (!%p797_p13)
}
 0x25a   : > { %687 = dma.vmem_to_hbm [thread:$0]  (%p952_p4), %s1074_s26, 128, %s1072_s5, %s518_s12  }
 0x25b   : > { %s523_s10 = scalar_lea.sflag [#allocation7], %s1063_s14  ;;  %s801_s13 = scalar_lea.vmem %s1081_s7, 128 }
 0x25c   : > { %p802_p0 = scmp.ne.s32.totalorder %s1081_s7, %s801_s13  ;;  %s886_s21 = smov [#allocation6]  }
 0x25d   : > { %s805_s29 = sshll.u32 %s886_s21, 4  ;;  %s806_s29 = int_to_ptr.vmem [resolvable:$false] %s805_s29 }
 0x25e   : > { %p803_p1 = pnand %p802_p0, %p952_p4  ;;  %s807_s30 = scalar_lea.vmem %s806_s29, 256 }
 0x25f   : > { %p808_p3 = scmp.lt.s32.totalorder %s1081_s7, %s806_s29  ;;  %p809_p5 = scmp.lt.s32.totalorder %s807_s30, %s801_s13 }
 0x260   : > { %p804_p2 = pneg %p803_p1 }
 0x261   : > { %p810_p6 = por %p809_p5, %p808_p3 }
 0x263   : > { %p811_p7 = pnand %p810_p6, %p804_p2 }
 0x265   : > { %814 = shalt.err (!%p811_p7)
}
 0x266   : > { %s815_s26 = scalar_lea.hbm %s1079_s11, 128  ;;  %s819_s12 = scalar_lea.hbm %s1151_s4, 256 }
 0x267   : > { %p816_p9 = scmp.ne.s32.totalorder %s1079_s11, %s815_s26  ;;  %p820_p12 = scmp.lt.s32.totalorder %s1079_s11, %s1151_s4 }
 0x268   : > { %p821_p13 = scmp.lt.s32.totalorder %s819_s12, %s815_s26 }
 0x269   : > { %p817_p10 = pnand %p816_p9, %p952_p4 }
 0x26a   : > { %p822_p0 = por %p821_p13, %p820_p12 }
 0x26b   : > { %p818_p11 = pneg %p817_p10 }
 0x26d   : > { %p823_p1 = pnand %p822_p0, %p818_p11 }
 0x26f   : > { %826 = shalt.err (!%p823_p1)
}
 0x270   : > { %688 = dma.vmem_to_hbm [thread:$0]  (%p952_p4), %s1081_s7, 128, %s1079_s11, %s523_s10  }
 0x271 PF: > { %p698_p2 = scmp.ge.s32.totalorder %s881_s20, 2  ;;  %s561_s6 = sand.u32 1, %s861_s15  }
 0x272   : > { %s562_s8 = scalar_lea.sflag [#allocation5], %s561_s6 }
 0x273   : > { %p692_p3 = pnand %p698_p2, %p959_p8 }
 0x275   : > { %p693_p5 = pneg %p692_p3 }
 0x277   : > { %852 = dma.done.wait (%p693_p5), %s562_s8, 128  }
 0x278   : > { %854 = vsyncadd (%p693_p5), %s562_s8, 4294967168  ;;  %s571_s9 = scalar_lea.sflag [#allocation7], %s561_s6 }
 0x279   : > { %856 = dma.done.wait (%p693_p5), %s571_s9, 128  }
 0x27a   : > { %858 = vsyncadd (%p693_p5), %s571_s9, 4294967168  ;;  %s21_s20 = sadd.s32 1, %s881_s20   ;;  %s1154_s15 = smov %s865_s16 }
 0x27b   : > { %p18_p6 = scmp.ge.s32.totalorder %s21_s20, 4   ;;  %s1155_s16 = smov %s869_s17 }
 0x27c   : > { %s1156_s17 = smov %s965_s28  ;;  %s1157_s18 = smov %s877_s19 }
 0x27d   : > { %s1158_s19 = smov %s1160_s23  ;;  %20 = sbr.rel (!%p18_p6) target bundleno = 6 (0x6), region = 95 }
 0x282   :  { %576 = vsyncpa [#allocation5], 1 }
 0x283   :  { %578 = vsyncpa [#allocation5 + $0x1], 1 }
 0x284   :  { %579 = vsyncpa [#allocation7], 1 }
 0x285   :  { %581 = vsyncpa [#allocation7 + $0x1], 1 }

</bundles_post_ra>
